<compile_context>
chip_gen: v6e
topology: v6e:2x2x1
jax: 0.10.0
libtpu: 0.0.40
codegen_flags: <defaults>
</compile_context>

<pallas_src>
import functools

import jax
import jax.numpy as jnp
from jax.experimental import pallas as pl
from jax.experimental.pallas import tpu as pltpu


def _vmem_limit_bytes(*blocks):
    """Scoped-VMEM request: double-buffered blocks + headroom, clamped."""
    total = 0
    for shape, dtype in blocks:
        n = 1
        for s in shape:
            n *= int(s)
        total += n * jnp.dtype(dtype).itemsize
    return int(min(max(2 * total + (8 << 20), 32 << 20), 112 << 20))


# ----------------------- fused projection + attention -----------------------

def _proj_attn_kernel(xo_ref, xia_ref, wq_ref, wkv1_ref, hmask2_ref, o_ref,
                      *, eps, lk):
    # xo_ref:   [1, Lq, D]   outside features (bf16)
    # xia_ref:  [1, Lk, D+1] inside features with a trailing ones column (bf16)
    # wq_ref:   [D, D] bf16
    # wkv1_ref: [D+1, 3D] bf16 = [[wk | wv/Lk | 0], [0 | 0 | 1]]
    # hmask2_ref: [D, 2D] f32 block-diagonal head mask, tiled twice on lanes
    # o_ref:    [1, Lq, D] bf16
    D = wq_ref.shape[0]

    q = jnp.dot(xo_ref[0], wq_ref[...], preferred_element_type=jnp.float32)     # [Lq, D]
    p = jnp.dot(xia_ref[0], wkv1_ref[...], preferred_element_type=jnp.float32)  # [Lk, 3D]

    # elu(x) + 1 feature map (f32, VPU/EUP).
    Q = jnp.where(q > 0, q + 1.0, jnp.exp(q))
    k = p[:, :D]
    K = jnp.where(k > 0, k + 1.0, jnp.exp(k))
    vaug = p[:, D:]                                   # [Lk, 2D] = [V/Lk | ones]

    # One KV matmul emits both KV and the per-channel K-sum (ones block),
    # masked to the per-head diagonal blocks.
    kvb = jax.lax.dot_general(
        K.astype(jnp.bfloat16), vaug.astype(jnp.bfloat16),
        dimension_numbers=(((0,), (0,)), ((), ())),
        preferred_element_type=jnp.float32) * hmask2_ref[...]       # [D, 2D]

    # One MXU pass produces numerator and denominator together.
    res = jnp.dot(Q.astype(jnp.bfloat16), kvb.astype(jnp.bfloat16),
                  preferred_element_type=jnp.float32)               # [Lq, 2D]
    num = res[:, :D]
    den = res[:, D:]
    z = pl.reciprocal(den + eps, approx=True)
    o_ref[0] = (num * z * float(lk)).astype(o_ref.dtype)


def proj_attention(outside, inside_aug, wq, wkv1, hmask2, eps=1e-6):
    """outside: [B, Lq, D] bf16; inside_aug: [B, Lk, D+1] bf16 -> [B, Lq, D] bf16."""
    B, Lq, D = outside.shape
    Lk, Da = inside_aug.shape[1], inside_aug.shape[2]
    kernel = functools.partial(_proj_attn_kernel, eps=eps, lk=Lk)
    vmem = _vmem_limit_bytes(((Lq, D), jnp.bfloat16), ((Lk, Da), jnp.bfloat16),
                             ((D, D), jnp.bfloat16), ((Da, 3 * D), jnp.bfloat16),
                             ((D, 2 * D), jnp.float32), ((Lq, D), jnp.bfloat16),
                             ((Lq, 3 * D), jnp.float32), ((Lk, 3 * D), jnp.float32))
    return pl.pallas_call(
        kernel,
        out_shape=jax.ShapeDtypeStruct((B, Lq, D), jnp.bfloat16),
        grid=(B,),
        in_specs=[pl.BlockSpec((1, Lq, D), lambda b: (b, 0, 0)),
                  pl.BlockSpec((1, Lk, Da), lambda b: (b, 0, 0)),
                  pl.BlockSpec((D, D), lambda b: (0, 0)),
                  pl.BlockSpec((Da, 3 * D), lambda b: (0, 0)),
                  pl.BlockSpec((D, 2 * D), lambda b: (0, 0))],
        out_specs=pl.BlockSpec((1, Lq, D), lambda b: (b, 0, 0)),
        compiler_params=pltpu.CompilerParams(
            dimension_semantics=("parallel",), vmem_limit_bytes=vmem),
    )(outside, inside_aug, wq, wkv1, hmask2)


# ------------------------------ 3x3 convolutions -----------------------------

def _conv1_kernel(feat_ref, tmp_ref, wf_ref, wm_ref, valid_ref, o_ref, stat_ref,
                  *, H, W, pre):
    # feat_ref/tmp_ref: [1, P, D] zero-padded flat images (bf16)
    # wf_ref/wm_ref: [9, D, D] bf16; valid_ref: [slab, 1] f32 wrap-column mask
    # o_ref: [1, P, D] bf16 (zero-bordered, conv2-ready); stat_ref: [1, 2, D] f32
    Wp = W + 2
    slab = H * Wp
    _, P, D = o_ref.shape
    start = pre + Wp + 1                    # 8-aligned interior start

    acc = jnp.zeros((slab, D), jnp.float32)
    for kh in range(3):
        for kw in range(3):
            off = pre + kh * Wp + kw
            t = kh * 3 + kw
            acc = acc + jnp.dot(feat_ref[0, off:off + slab, :], wf_ref[t],
                                preferred_element_type=jnp.float32)
            acc = acc + jnp.dot(tmp_ref[0, off:off + slab, :], wm_ref[t],
                                preferred_element_type=jnp.float32)

    y = acc * valid_ref[...]                # zero the wrap-around columns

    # BN1 channel statistics (sum / sum of squares) over valid positions only.
    stat_ref[0, 0:1, :] = jnp.sum(y, axis=0, keepdims=True)
    stat_ref[0, 1:2, :] = jnp.sum(y * y, axis=0, keepdims=True)

    # Border-only zero stores + one sublane-aligned interior slab store
    # (no full-buffer zeroing, output already padded-flat for conv2).
    o_ref[0, 0:start, :] = jnp.zeros((start, D), o_ref.dtype)
    o_ref[0, start:start + slab, :] = y.astype(o_ref.dtype)
    o_ref[0, start + slab:P, :] = jnp.zeros((P - start - slab, D), o_ref.dtype)


def conv1(feat_pad, tmp_pad, w_feat, w_msg, valid, H, W, pre):
    B, P, D = feat_pad.shape
    slab = H * (W + 2)
    kernel = functools.partial(_conv1_kernel, H=H, W=W, pre=pre)
    vmem = _vmem_limit_bytes(((P, D), jnp.bfloat16), ((P, D), jnp.bfloat16),
                             ((9, D, D), jnp.bfloat16), ((9, D, D), jnp.bfloat16),
                             ((slab, 1), jnp.float32), ((P, D), jnp.bfloat16),
                             ((2, D), jnp.float32), ((slab, D), jnp.float32))
    return pl.pallas_call(
        kernel,
        out_shape=(jax.ShapeDtypeStruct((B, P, D), jnp.bfloat16),
                   jax.ShapeDtypeStruct((B, 2, D), jnp.float32)),
        grid=(B,),
        in_specs=[pl.BlockSpec((1, P, D), lambda b: (b, 0, 0)),
                  pl.BlockSpec((1, P, D), lambda b: (b, 0, 0)),
                  pl.BlockSpec((9, D, D), lambda b: (0, 0, 0)),
                  pl.BlockSpec((9, D, D), lambda b: (0, 0, 0)),
                  pl.BlockSpec((slab, 1), lambda b: (0, 0))],
        out_specs=(pl.BlockSpec((1, P, D), lambda b: (b, 0, 0)),
                   pl.BlockSpec((1, 2, D), lambda b: (b, 0, 0))),
        compiler_params=pltpu.CompilerParams(
            dimension_semantics=("parallel",), vmem_limit_bytes=vmem),
    )(feat_pad, tmp_pad, w_feat, w_msg, valid)


def _conv2_kernel(x_ref, scale_ref, shift_ref, w_ref, interior_ref, valid_ref,
                  o_ref, stat_ref, xs_ref, *, H, W, pre):
    # x_ref: [1, P, D] conv1 output (padded-flat, bf16)
    # scale/shift: [1, D] BN1 affine; w_ref: [9, D, D] bf16
    # interior_ref: [P, 1] f32; valid_ref: [slab, 1] f32
    # o_ref: [1, slab, D] bf16 raw conv2 output (padded-row slab layout)
    # stat_ref: [1, 2, D] f32; xs_ref: VMEM bf16 scratch (affined padded input)
    Wp = W + 2
    slab = H * Wp
    D = o_ref.shape[-1]

    # BN1 affine fused into the load; interior mask keeps the zero border exact.
    xs_ref[...] = (x_ref[0].astype(jnp.float32) * scale_ref[...]
                   + shift_ref[...] * interior_ref[...]).astype(jnp.bfloat16)

    acc = jnp.zeros((slab, D), jnp.float32)
    for kh in range(3):
        for kw in range(3):
            off = pre + kh * Wp + kw
            t = kh * 3 + kw
            acc = acc + jnp.dot(xs_ref[off:off + slab, :], w_ref[t],
                                preferred_element_type=jnp.float32)

    y = acc * valid_ref[...]

    stat_ref[0, 0:1, :] = jnp.sum(y, axis=0, keepdims=True)
    stat_ref[0, 1:2, :] = jnp.sum(y * y, axis=0, keepdims=True)

    # Lane/sublane-dense contiguous slab store; depadding is an XLA slice.
    o_ref[0] = y.astype(o_ref.dtype)


def conv2(y1_pad, scale1, shift1, w, interior, valid, H, W, pre):
    B, P, D = y1_pad.shape
    slab = H * (W + 2)
    kernel = functools.partial(_conv2_kernel, H=H, W=W, pre=pre)
    vmem = _vmem_limit_bytes(((P, D), jnp.bfloat16), ((1, D), jnp.float32),
                             ((1, D), jnp.float32), ((9, D, D), jnp.bfloat16),
                             ((P, 1), jnp.float32), ((slab, 1), jnp.float32),
                             ((slab, D), jnp.bfloat16), ((2, D), jnp.float32),
                             ((P, D), jnp.bfloat16), ((slab, D), jnp.float32))
    return pl.pallas_call(
        kernel,
        out_shape=(jax.ShapeDtypeStruct((B, slab, D), jnp.bfloat16),
                   jax.ShapeDtypeStruct((B, 2, D), jnp.float32)),
        grid=(B,),
        in_specs=[pl.BlockSpec((1, P, D), lambda b: (b, 0, 0)),
                  pl.BlockSpec((1, D), lambda b: (0, 0)),
                  pl.BlockSpec((1, D), lambda b: (0, 0)),
                  pl.BlockSpec((9, D, D), lambda b: (0, 0, 0)),
                  pl.BlockSpec((P, 1), lambda b: (0, 0)),
                  pl.BlockSpec((slab, 1), lambda b: (0, 0))],
        out_specs=(pl.BlockSpec((1, slab, D), lambda b: (b, 0, 0)),
                   pl.BlockSpec((1, 2, D), lambda b: (b, 0, 0))),
        scratch_shapes=[pltpu.VMEM((P, D), jnp.bfloat16)],
        compiler_params=pltpu.CompilerParams(
            dimension_semantics=("parallel",), vmem_limit_bytes=vmem),
    )(y1_pad, scale1.reshape(1, D), shift1.reshape(1, D), w, interior, valid)


# ----------------------- BN2 affine + residual (fused) -----------------------

def _affine_residual_kernel(x_ref, scale_ref, shift_ref, res_ref, o_ref):
    o_ref[...] = (x_ref[...].astype(jnp.float32) * scale_ref[...]
                  + shift_ref[...] + res_ref[...])


def _affine_residual_call(x, scale, shift, res):
    M, C = x.shape
    bm = M
    for cand in (1024, 512, 256):
        if M % cand == 0:
            bm = cand
            break
    vmem = _vmem_limit_bytes(((bm, C), x.dtype), ((1, C), jnp.float32),
                             ((1, C), jnp.float32), ((bm, C), jnp.float32),
                             ((bm, C), jnp.float32))
    return pl.pallas_call(
        _affine_residual_kernel,
        out_shape=jax.ShapeDtypeStruct((M, C), jnp.float32),
        grid=(M // bm,),
        in_specs=[pl.BlockSpec((bm, C), lambda i: (i, 0)),
                  pl.BlockSpec((1, C), lambda i: (0, 0)),
                  pl.BlockSpec((1, C), lambda i: (0, 0)),
                  pl.BlockSpec((bm, C), lambda i: (i, 0))],
        out_specs=pl.BlockSpec((bm, C), lambda i: (i, 0)),
        compiler_params=pltpu.CompilerParams(
            dimension_semantics=("parallel",), vmem_limit_bytes=vmem),
    )(x, scale, shift, res)


def affine_residual(x, scale, shift, res):
    """out = x*scale + shift + res (per-channel scale/shift). x: [M, C] bf16, res f32."""
    M, C = x.shape
    scale = scale.reshape(1, C).astype(jnp.float32)
    shift = shift.reshape(1, C).astype(jnp.float32)
    if C < 128 and 128 % C == 0 and (M * C) % 128 == 0 and ((M * C) // 128) % 8 == 0:
        # Lane-dense view: fold channels into 128-wide lanes (unmasked stores).
        rep = 128 // C
        M2 = (M * C) // 128
        out = _affine_residual_call(x.reshape(M2, 128),
                                    jnp.tile(scale, (1, rep)),
                                    jnp.tile(shift, (1, rep)),
                                    res.reshape(M2, 128))
        return out.reshape(M, C)
    return _affine_residual_call(x, scale, shift, res)


# --------------------------------- JAX glue ----------------------------------

def bn_from_sums(stats, count, gamma, beta, eps=1e-5):
    """Training-mode BatchNorm2d scale/shift from kernel-emitted channel sums."""
    s = jnp.sum(stats[:, 0, :], axis=0)
    ss = jnp.sum(stats[:, 1, :], axis=0)
    mean = s / count
    var = ss / count - mean * mean          # biased batch variance
    scale = gamma / jnp.sqrt(var + eps)
    shift = beta - mean * scale
    return scale, shift


def init_params(key, d_model):
    keys = jax.random.split(key, 6)
    s = 0.1
    D = d_model
    return dict(
        # linear weights stored [in, out] (i.e. torch weight transposed)
        w_q=jax.random.normal(keys[0], (D, D), jnp.float32) * s,
        w_k=jax.random.normal(keys[1], (D, D), jnp.float32) * s,
        w_v=jax.random.normal(keys[2], (D, D), jnp.float32) * s,
        # conv weights tap-major [9, Cin, Cout]; conv1 split into feat/msg halves
        conv1_w_feat=jax.random.normal(keys[3], (9, D, D), jnp.float32) * s,
        conv1_w_msg=jax.random.normal(keys[4], (9, D, D), jnp.float32) * s,
        conv2_w=jax.random.normal(keys[5], (9, D, D), jnp.float32) * s,
        bn1_gamma=jnp.ones((D,), jnp.float32),
        bn1_beta=jnp.zeros((D,), jnp.float32),
        bn2_gamma=jnp.ones((D,), jnp.float32),
        bn2_beta=jnp.zeros((D,), jnp.float32),
    )


def combine1_forward(params, feat0, zone_mask, H, W, B, D, nhead):
    """feat0: [B, L, D] f32; zone_mask: [B, L, D] bool (uniform over channels)."""
    old_feat0 = feat0
    L = H * W
    Wp = W + 2
    pre = (-(Wp + 1)) % 8                   # 8-align the interior start row
    P = pre + (H + 2) * Wp + 2              # +2: last 3x3 tap's slab overrun
    P = ((P + 7) // 8) * 8
    slab = H * Wp

    # --- masked_select semantics: gather inside/outside positions (glue) ---
    # (requires equal counts per batch element; mask must be concrete here)
    pos_inside = zone_mask[:, :, 0]                      # [B, L]
    num_inside = int(jnp.sum(pos_inside[0]))
    num_outside = L - num_inside
    inside_idx = jnp.stack(
        [jnp.nonzero(pos_inside[b], size=num_inside)[0] for b in range(B)])
    outside_idx = jnp.stack(
        [jnp.nonzero(~pos_inside[b], size=num_outside)[0] for b in range(B)])
    gather = jax.vmap(lambda f, idx: f[idx])
    inside_features = gather(feat0, inside_idx).astype(jnp.bfloat16)
    outside_features = gather(feat0, outside_idx).astype(jnp.bfloat16)

    # --- attention operands precomputed on the host (hoisted out of the kernel) ---
    dh = D // nhead
    heads = jnp.arange(D) // dh
    hmask = (heads[:, None] == heads[None, :]).astype(jnp.float32)      # [D, D]
    hmask2 = jnp.concatenate([hmask, hmask], axis=-1)                   # [D, 2D]
    # Fused projection weight [[wk | wv/Lk | 0], [0 | 0 | 1]]: with a ones column
    # appended to the inside features, one matmul emits K, V/Lk and an all-ones
    # block (whose KV product is the per-head K-sum -> denominator).
    zero_dd = jnp.zeros((D, D), jnp.float32)
    wkv1 = jnp.concatenate(
        [jnp.concatenate([params["w_k"], params["w_v"] / float(num_inside), zero_dd],
                         axis=1),
         jnp.concatenate([jnp.zeros((1, 2 * D), jnp.float32),
                          jnp.ones((1, D), jnp.float32)], axis=1)],
        axis=0).astype(jnp.bfloat16)                                    # [D+1, 3D]
    inside_aug = jnp.concatenate(
        [inside_features, jnp.ones((B, num_inside, 1), jnp.bfloat16)], axis=-1)

    # --- fused q/(k|v|1) projection + LoFTR linear attention (head-packed) ---
    msg = proj_attention(outside_features, inside_aug,
                         params["w_q"].astype(jnp.bfloat16), wkv1, hmask2)

    # --- scatter message directly into the zero-padded conv layout ---
    pad_out_idx = pre + (outside_idx // W + 1) * Wp + (outside_idx % W) + 1
    tmp_pad = jnp.zeros((B, P, D), jnp.bfloat16)
    tmp_pad = jax.vmap(lambda t, idx, m: t.at[idx].set(m))(tmp_pad, pad_out_idx, msg)

    feat_img = jnp.pad(feat0.reshape(B, H, W, D), ((0, 0), (1, 1), (1, 1), (0, 0)))
    feat_pad = jnp.pad(feat_img.reshape(B, (H + 2) * Wp, D),
                       ((0, 0), (pre, P - pre - (H + 2) * Wp), (0, 0))
                       ).astype(jnp.bfloat16)

    # --- precomputed masks (constant index_map -> no per-step iota chains) ---
    col = jnp.arange(slab) % Wp
    valid = (col < W).astype(jnp.float32).reshape(slab, 1)
    fidx = jnp.arange(P) - pre
    r, c = fidx // Wp, fidx % Wp
    interior = ((fidx >= 0) & (r >= 1) & (r <= H) & (c >= 1) & (c <= W)
                ).astype(jnp.float32).reshape(P, 1)

    # --- conv1 (no channel concat in HBM) + BN1 sums ---
    y1_pad, stats1 = conv1(feat_pad, tmp_pad,
                           params["conv1_w_feat"].astype(jnp.bfloat16),
                           params["conv1_w_msg"].astype(jnp.bfloat16),
                           valid, H, W, pre)
    s1, b1 = bn_from_sums(stats1, B * L, params["bn1_gamma"], params["bn1_beta"])

    # --- conv2 with fused BN1 affine + BN2 sums ---
    y2_slab, stats2 = conv2(y1_pad, s1, b1, params["conv2_w"].astype(jnp.bfloat16),
                            interior, valid, H, W, pre)
    s2, b2 = bn_from_sums(stats2, B * L, params["bn2_gamma"], params["bn2_beta"])

    # depad the lane/sublane-dense conv2 slab (XLA slice; no in-kernel row loop)
    y2 = y2_slab.reshape(B, H, Wp, D)[:, :, :W, :].reshape(B, L, D)

    # --- BN2 affine fused with the residual add ---
    out = affine_residual(y2.reshape(B * L, D), s2, b2,
                          old_feat0.reshape(B * L, D)).reshape(B, L, D)

    # TODO(synk): Block14 (large_kernel_path) definition was not provided in the
    # reference source, so it is treated as identity here; the surrounding
    # b(hw)c <-> bchw rearranges then compose to a no-op.
    return out


if __name__ == "__main__":
    B, H, W = 2, 8, 8
    d_model, nhead = 32, 4
    D = d_model
    L = H * W

    key = jax.random.PRNGKey(0)
    k_feat, k_param = jax.random.split(key)
    feat0 = jax.random.normal(k_feat, (B, L, D), jnp.float32)

    # Zone mask: every other position is "inside"; uniform over channels/batch.
    pos = (jnp.arange(L) % 2 == 0)
    zone_mask = jnp.broadcast_to(pos[None, :, None], (B, L, D))

    params = init_params(k_param, d_model)
    out = combine1_forward(params, feat0, zone_mask, H, W, B, D, nhead)
    jax.block_until_ready(out)
    assert out.shape == (B, L, D) and out.dtype == jnp.float32
    print("KERNEL_OK")
</pallas_src>

<mosaic_0001>
module attributes {stable_mosaic.version = 11 : i64} {
  func.func @_proj_attn_kernel(%arg0: i32, %arg1: memref<1x32x32xbf16, #tpu.memory_space<vmem>>, %arg2: memref<1x32x33xbf16, #tpu.memory_space<vmem>>, %arg3: memref<32x32xbf16, #tpu.memory_space<vmem>>, %arg4: memref<33x96xbf16, #tpu.memory_space<vmem>>, %arg5: memref<32x64xf32, #tpu.memory_space<vmem>>, %arg6: memref<1x32x32xbf16, #tpu.memory_space<vmem>>) attributes {dimension_semantics = [#tpu.dimension_semantics<parallel>], iteration_bounds = array<i64: 2>, scalar_prefetch = 0 : i64, scratch_operands = 0 : i64, tpu.core_type = #tpu.core_type<tc>, window_params = [{transform_indices = @transform_0, window_bounds = array<i64: 1, 32, 32>}, {transform_indices = @transform_1, window_bounds = array<i64: 1, 32, 33>}, {pipeline_mode = #tpu.pipeline_mode<synchronous>, transform_indices = @transform_2, window_bounds = array<i64: 32, 32>}, {pipeline_mode = #tpu.pipeline_mode<synchronous>, transform_indices = @transform_3, window_bounds = array<i64: 33, 96>}, {pipeline_mode = #tpu.pipeline_mode<synchronous>, transform_indices = @transform_4, window_bounds = array<i64: 32, 64>}, {transform_indices = @transform_5, window_bounds = array<i64: 1, 32, 32>}]} {
    %c0 = arith.constant 0 : index
    %c0_0 = arith.constant 0 : index
    %c0_1 = arith.constant 0 : index
    %0 = vector.load %arg1[%c0, %c0_0, %c0_1] : memref<1x32x32xbf16, #tpu.memory_space<vmem>>, vector<1x32x32xbf16>
    %1 = vector.shape_cast %0 : vector<1x32x32xbf16> to vector<32x32xbf16>
    %c0_2 = arith.constant 0 : index
    %c0_3 = arith.constant 0 : index
    %2 = vector.load %arg3[%c0_2, %c0_3] : memref<32x32xbf16, #tpu.memory_space<vmem>>, vector<32x32xbf16>
    %cst = arith.constant dense<0.000000e+00> : vector<32x32xf32>
    %3 = tpu.matmul %1, %2, %cst {dimension_numbers = #tpu.dot_dimension_numbers<[1], [0], [0], [1], [0, 0, 1, 1], [], []>} : vector<32x32xbf16>, vector<32x32xbf16>, vector<32x32xf32> -> vector<32x32xf32>
    %c0_4 = arith.constant 0 : index
    %c0_5 = arith.constant 0 : index
    %c0_6 = arith.constant 0 : index
    %4 = vector.load %arg2[%c0_4, %c0_5, %c0_6] : memref<1x32x33xbf16, #tpu.memory_space<vmem>>, vector<1x32x33xbf16>
    %5 = vector.shape_cast %4 : vector<1x32x33xbf16> to vector<32x33xbf16>
    %c0_7 = arith.constant 0 : index
    %c0_8 = arith.constant 0 : index
    %6 = vector.load %arg4[%c0_7, %c0_8] : memref<33x96xbf16, #tpu.memory_space<vmem>>, vector<33x96xbf16>
    %cst_9 = arith.constant dense<0.000000e+00> : vector<32x96xf32>
    %7 = tpu.matmul %5, %6, %cst_9 {dimension_numbers = #tpu.dot_dimension_numbers<[1], [0], [0], [1], [0, 0, 1, 1], [], []>} : vector<32x33xbf16>, vector<33x96xbf16>, vector<32x96xf32> -> vector<32x96xf32>
    %cst_10 = arith.constant 0.000000e+00 : f32
    %8 = vector.broadcast %cst_10 : f32 to vector<32x32xf32>
    %9 = arith.cmpf ogt, %3, %8 : vector<32x32xf32>
    %cst_11 = arith.constant 1.000000e+00 : f32
    %10 = vector.broadcast %cst_11 : f32 to vector<32x32xf32>
    %11 = arith.addf %3, %10 : vector<32x32xf32>
    %12 = math.exp %3 : vector<32x32xf32>
    %13 = arith.select %9, %11, %12 : vector<32x32xi1>, vector<32x32xf32>
    %14 = vector.extract_strided_slice %7 {offsets = [0, 0], sizes = [32, 32], strides = [1, 1]} : vector<32x96xf32> to vector<32x32xf32>
    %cst_12 = arith.constant 0.000000e+00 : f32
    %15 = vector.broadcast %cst_12 : f32 to vector<32x32xf32>
    %16 = arith.cmpf ogt, %14, %15 : vector<32x32xf32>
    %cst_13 = arith.constant 1.000000e+00 : f32
    %17 = vector.broadcast %cst_13 : f32 to vector<32x32xf32>
    %18 = arith.addf %14, %17 : vector<32x32xf32>
    %19 = math.exp %14 : vector<32x32xf32>
    %20 = arith.select %16, %18, %19 : vector<32x32xi1>, vector<32x32xf32>
    %21 = vector.extract_strided_slice %7 {offsets = [0, 32], sizes = [32, 64], strides = [1, 1]} : vector<32x96xf32> to vector<32x64xf32>
    %22 = arith.truncf %20 : vector<32x32xf32> to vector<32x32xbf16>
    %23 = arith.truncf %21 : vector<32x64xf32> to vector<32x64xbf16>
    %cst_14 = arith.constant dense<0.000000e+00> : vector<32x64xf32>
    %24 = tpu.matmul %22, %23, %cst_14 {dimension_numbers = #tpu.dot_dimension_numbers<[0], [0], [1], [1], [0, 1, 1, 1], [], []>} : vector<32x32xbf16>, vector<32x64xbf16>, vector<32x64xf32> -> vector<32x64xf32>
    %c0_15 = arith.constant 0 : index
    %c0_16 = arith.constant 0 : index
    %25 = vector.load %arg5[%c0_15, %c0_16] : memref<32x64xf32, #tpu.memory_space<vmem>>, vector<32x64xf32>
    %26 = arith.mulf %24, %25 : vector<32x64xf32>
    %27 = arith.truncf %13 : vector<32x32xf32> to vector<32x32xbf16>
    %28 = arith.truncf %26 : vector<32x64xf32> to vector<32x64xbf16>
    %cst_17 = arith.constant dense<0.000000e+00> : vector<32x64xf32>
    %29 = tpu.matmul %27, %28, %cst_17 {dimension_numbers = #tpu.dot_dimension_numbers<[1], [0], [0], [1], [0, 0, 1, 1], [], []>} : vector<32x32xbf16>, vector<32x64xbf16>, vector<32x64xf32> -> vector<32x64xf32>
    %30 = vector.extract_strided_slice %29 {offsets = [0, 0], sizes = [32, 32], strides = [1, 1]} : vector<32x64xf32> to vector<32x32xf32>
    %31 = vector.extract_strided_slice %29 {offsets = [0, 32], sizes = [32, 32], strides = [1, 1]} : vector<32x64xf32> to vector<32x32xf32>
    %cst_18 = arith.constant 9.99999997E-7 : f32
    %32 = vector.broadcast %cst_18 : f32 to vector<32x32xf32>
    %33 = arith.addf %31, %32 : vector<32x32xf32>
    %34 = tpu.reciprocal %33 {approx = true} : vector<32x32xf32> -> vector<32x32xf32>
    %35 = arith.mulf %30, %34 : vector<32x32xf32>
    %cst_19 = arith.constant 3.200000e+01 : f32
    %36 = vector.broadcast %cst_19 : f32 to vector<32x32xf32>
    %37 = arith.mulf %35, %36 : vector<32x32xf32>
    %38 = arith.truncf %37 : vector<32x32xf32> to vector<32x32xbf16>
    %c0_20 = arith.constant 0 : index
    %c0_21 = arith.constant 0 : index
    %c0_22 = arith.constant 0 : index
    %39 = vector.load %arg6[%c0_20, %c0_21, %c0_22] : memref<1x32x32xbf16, #tpu.memory_space<vmem>>, vector<1x32x32xbf16>
    %40 = vector.shape_cast %39 : vector<1x32x32xbf16> to vector<32x32xbf16>
    %41 = vector.shape_cast %38 : vector<32x32xbf16> to vector<1x32x32xbf16>
    tpu.vector_store %arg6[%c0_20, %c0_21, %c0_22], %41 {strides = array<i32>} : memref<1x32x32xbf16, #tpu.memory_space<vmem>>, vector<1x32x32xbf16>,
    return
  }
  func.func @transform_0(%arg0: i32) -> (i32, i32, i32) {
    %c0_i32 = arith.constant 0 : i32
    %c0_i32_0 = arith.constant 0 : i32
    %c0_i32_1 = arith.constant 0 : i32
    return %arg0, %c0_i32, %c0_i32_0 : i32, i32, i32
  }
  func.func @transform_1(%arg0: i32) -> (i32, i32, i32) {
    %c0_i32 = arith.constant 0 : i32
    %c0_i32_0 = arith.constant 0 : i32
    %c0_i32_1 = arith.constant 0 : i32
    return %arg0, %c0_i32, %c0_i32_0 : i32, i32, i32
  }
  func.func @transform_2(%arg0: i32) -> (i32, i32) {
    %c0_i32 = arith.constant 0 : i32
    %c0_i32_0 = arith.constant 0 : i32
    %c0_i32_1 = arith.constant 0 : i32
    return %c0_i32, %c0_i32_0 : i32, i32
  }
  func.func @transform_3(%arg0: i32) -> (i32, i32) {
    %c0_i32 = arith.constant 0 : i32
    %c0_i32_0 = arith.constant 0 : i32
    %c0_i32_1 = arith.constant 0 : i32
    return %c0_i32, %c0_i32_0 : i32, i32
  }
  func.func @transform_4(%arg0: i32) -> (i32, i32) {
    %c0_i32 = arith.constant 0 : i32
    %c0_i32_0 = arith.constant 0 : i32
    %c0_i32_1 = arith.constant 0 : i32
    return %c0_i32, %c0_i32_0 : i32, i32
  }
  func.func @transform_5(%arg0: i32) -> (i32, i32, i32) {
    %c0_i32 = arith.constant 0 : i32
    %c0_i32_0 = arith.constant 0 : i32
    %c0_i32_1 = arith.constant 0 : i32
    return %arg0, %c0_i32, %c0_i32_0 : i32, i32, i32
  }
}

</mosaic_0001>

<bundles_post_ra>
// kernel: tpu_custom_call.1
= control target key start
LH: loop header
LB: loop body
LE: loop exit
PB: predicated region body
PF: predicated region fallthrough
CT: control target
= control target key end

     0   :  { %s1654_s0 = inlined_call_operand.hbm [shape: bf16[2,32,32], index: 0, kind: input, shape index: {}]   ;;  %s1655_s1 = inlined_call_operand.hbm [shape: bf16[2,32,33], index: 1, kind: input, shape index: {}]   ;;  %s1656_s2 = inlined_call_operand.hbm [shape: bf16[32,32], index: 2, kind: input, shape index: {}]   ;;  %s1657_s3 = inlined_call_operand.hbm [shape: bf16[33,96], index: 3, kind: input, shape index: {}]   ;;  %s1658_s4 = inlined_call_operand.hbm [shape: f32[32,64], index: 4, kind: input, shape index: {}]   ;;  %s1659_s5 = inlined_call_operand.hbm [shape: bf16[2,32,32], index: 5, kind: output, shape index: {}]  }
   0x1   :  { %1667 = sst [smem:[#allocation17_spill]] %s1654_s0 }
   0x2   :  { %1668 = sst [smem:[#allocation18_spill]] %s1656_s2 }
   0x3   :  { %1669 = sst [smem:[#allocation19_spill]] %s1657_s3 }
   0x4   :  { %1670 = sst [smem:[#allocation20_spill]] %s1658_s4 }
   0x5   :  { %10 = vsyncpa [#allocation3], 0 }
   0x6   :  { %12 = vsyncpa [#allocation3 + $0x1], 0 }
   0x7   :  { %13 = vsyncpa [#allocation6], 0 }
   0x8   :  { %15 = vsyncpa [#allocation6 + $0x1], 0 }
   0x9   :  { %16 = vsyncpa [#allocation9], 0 }
   0xa   :  { %17 = vsyncpa [#allocation4], 0 }
   0xb   :  { %19 = vsyncpa [#allocation4 + $0x1], 0  ;;  %s1372_s18 = smov 0   ;;  %s1374_s19 = smov 0  }
   0xc   :  { %s1376_s20 = smov 0   ;;  %s1378_s21 = smov 0  }
   0xd LB: > { %s1393_s22 = sadd.s32 4294967295, %s1326_s21   ;;  %s890_s23 = sadd.s32 4294967294, %s1326_s21   ;;  %s1326_s21 = sphi %s1378_s21, %s1694_s21   ;;  %s1322_s20 = sphi %s1376_s20, %s1693_s20   ;;  %s1318_s19 = sphi %s1374_s19, %s1692_s19   ;;  %s1314_s18 = sphi %s1372_s18, %s1691_s18  }
   0xe   : > { %p45_p0 = scmp.ne.s32.totalorder %s1318_s19, %s1314_s18  ;;  %p1660_p1 = scmp.eq.s32.totalorder %s1393_s22, 0 }
   0xf   : > { %p158_p2 = scmp.eq.s32.totalorder %s1393_s22, 1  ;;  %p164_p3 = scmp.eq.s32.totalorder %s890_s23, 1 }
  0x10   : > { %p1402_p4 = por %p1660_p1, %p45_p0  ;;  %p891_p5 = scmp.ge.s32.totalorder %s1326_s21, 1 }
  0x11   : > { %p1407_p6 = por %p164_p3, %p45_p0  ;;  %p171_p7 = scmp.lt.s32.totalorder %s1326_s21, 3 }
  0x12   : > { %s1671_s24 = scalar_select %p1402_p4, 1, 0 }
  0x13   : > { %s1672_s25 = scalar_select %p1407_p6, 1, 0 }
  0x14   : > { %p1412_p8 = pnand %p891_p5, %p171_p7  ;;  %s1328_s27 = smov [#allocation7]  }
  0x15   : > { %s183_s28 = sshll.u32 %s1328_s27, 4  ;;  %s1329_s30 = smov [#allocation8]   ;;  %s184_s28 = int_to_ptr.vmem [resolvable:$true] %s183_s28 }
  0x16   : > { %p1011_p9 = pneg %p1412_p8  ;;  %s196_s6 = sshll.u32 %s1329_s30, 4  ;;  %s197_s6 = int_to_ptr.vmem [resolvable:$true] %s196_s6 }
  0x17   : > { %s1330_s7 = smov [#allocation10]   ;;  %s1127_s9 = scalar_lea.vmem %s184_s28, 256 }
  0x18   : > { %p1421_p11 = pnand %p1011_p9, %p1660_p1  ;;  %s209_s8 = sshll.u32 %s1330_s7, 4  ;;  %s210_s8 = int_to_ptr.vmem [resolvable:$true] %s209_s8 }
  0x19   : > { %p1128_p13 = scmp.ne.s32.totalorder %s184_s28, %s1127_s9  ;;  %p1135_p5 = scmp.lt.s32.totalorder %s184_s28, %s184_s28 }
  0x1a   : > { %p1118_p12 = pneg %p1421_p11  ;;  %p1136_p7 = scmp.lt.s32.totalorder %s1127_s9, %s1127_s9 }
  0x1c   : > { %p1130_p0 = pnand %p1128_p13, %p1118_p12  ;;  %p1137_p9 = por %p1136_p7, %p1135_p5 }
  0x1e   : > { %p1131_p3 = pneg %p1130_p0 }
  0x20   : > { %p1138_p10 = pnand %p1137_p9, %p1131_p3 }
  0x22   : > { %1141 = shalt.err (!%p1138_p10)
}
  0x23   : > { %s1661_s10 = smov 64   ;;  %s1663_s11 = smov 4  }
  0x24   : > { %s1675_s2 = sld [smem:[#allocation18_spill]]  ;;  %s1153_s14 = scalar_lea.vmem %s197_s6, 320 }
  0x25   : > { %p1154_p13 = scmp.ne.s32.totalorder %s197_s6, %s1153_s14  ;;  %p1161_p3 = scmp.lt.s32.totalorder %s197_s6, %s197_s6 }
  0x26   : > { %p1162_p10 = scmp.lt.s32.totalorder %s1153_s14, %s1153_s14 }
  0x27   : > { %p1156_p0 = pnand %p1154_p13, %p1118_p12 }
  0x28   : > { %p1163_p7 = por %p1162_p10, %p1161_p3 }
  0x29   : > { %p1157_p5 = pneg %p1156_p0 }
  0x2a   : > { %1014 = dma.hbm_to_vmem [thread:$0]  (!%p1421_p11), %s1675_s2, 256, %s184_s28, [#allocation6], %s1661_s10, %s1661_s10, %s1663_s11  }
  0x2b   : > { %p1164_p9 = pnand %p1163_p7, %p1157_p5 }
  0x2d   : > { %1167 = shalt.err (!%p1164_p9)
}
  0x2e   : > { %s1676_s3 = sld [smem:[#allocation19_spill]]  ;;  %s1179_s17 = scalar_lea.vmem %s210_s8, 512 }
  0x2f   : > { %p1180_p1 = scmp.ne.s32.totalorder %s210_s8, %s1179_s17  ;;  %p1187_p3 = scmp.lt.s32.totalorder %s210_s8, %s210_s8 }
  0x30   : > { %p1188_p5 = scmp.lt.s32.totalorder %s1179_s17, %s1179_s17 }
  0x31   : > { %p1182_p13 = pnand %p1180_p1, %p1118_p12 }
  0x32   : > { %p1189_p10 = por %p1188_p5, %p1187_p3 }
  0x33   : > { %p1183_p0 = pneg %p1182_p13 }
  0x34   : > { %1017 = dma.hbm_to_vmem [thread:$0]  (!%p1421_p11), %s1676_s3, 320, %s197_s6, [#allocation9], %s1661_s10, %s1661_s10, %s1663_s11  }
  0x35   : > { %p1190_p7 = pnand %p1189_p10, %p1183_p0 }
  0x37   : > { %1193 = shalt.err (!%p1190_p7)
}
  0x38   : > { %s1333_s23 = smov 128   ;;  %s1334_s27 = smov 8  }
  0x39   : > { %s1677_s4 = sld [smem:[#allocation20_spill]]  ;;  %s1458_s6 = sadd.s32 1, %s1326_s21  }
  0x3a   : > { %s29_s7 = ssub.s32 %s1326_s21, %s1458_s6  ;;  %s32_s9 = sadd.s32 1, %s1322_s20 }
  0x3b   : > { %p30_p1 = scmp.eq.s32.totalorder %s29_s7, 0  ;;  %p39_p12 = scmp.ne.s32.totalorder %s1322_s20, %s1318_s19 }
  0x3c   : > { %p40_p9 = scmp.eq.s32.totalorder %s1326_s21, 0  ;;  %p1035_p13 = scmp.lt.s32.totalorder %s1326_s21, 2 }
  0x3d   : > { %s1468_s12 = scalar_select %p30_p1, %s1322_s20, %s32_s9  }
  0x3e   : > { %p41_p0 = por %p40_p9, %p39_p12  ;;  %p1472_p3 = por %p158_p2, %p39_p12 }
  0x3f   : > { %1020 = dma.hbm_to_vmem [thread:$0]  (!%p1421_p11), %s1677_s4, 512, %s210_s8, [#allocation9], %s1333_s23, %s1333_s23, %s1334_s27  }
  0x40   : > { %s1678_s13 = scalar_select %p1472_p3, 1, 0 }
  0x41   : > { %s223_s29 = sand.u32 1, %s1322_s20   ;;  %s935_s14 = sshll.u32 %s1326_s21, 8 }
  0x42   : > { %s1478_s8 = sshll.u32 %s223_s29, 4  ;;  %s1679_s0 = sld [smem:[#allocation17_spill]] }
  0x43   : > { %s227_s23 = scalar_lea.vmem [#allocation2], %s1478_s8  ;;  %p1486_p11 = pnand %p1035_p13, %p41_p0 }
  0x44   : > { %s234_s27 = sshll.u32 %s227_s23, 4  ;;  %s1495_s9 = scalar_lea.hbm %s1655_s1, %s935_s14  ;;  %s1490_s27 = int_to_ptr.vmem [resolvable:$true] %s234_s27 }
  0x45   : > { %s1497_s15 = scalar_lea.sflag [#allocation3], %s223_s29  ;;  %p1196_p5 = pneg %p1486_p11 }
  0x48   : > { %s1483_s17 = scalar_lea.hbm %s1679_s0, %s935_s14  ;;  %s1199_s11 = scalar_lea.hbm %s1679_s0, 512 }
  0x49   : > { %s1194_s16 = scalar_lea.hbm %s1483_s17, 256  ;;  %p1200_p1 = scmp.lt.s32.totalorder %s1483_s17, %s1679_s0 }
  0x4a   : > { %p1195_p2 = scmp.ne.s32.totalorder %s1483_s17, %s1194_s16  ;;  %p1201_p12 = scmp.lt.s32.totalorder %s1199_s11, %s1194_s16 }
  0x4c   : > { %p1197_p10 = pnand %p1196_p5, %p1195_p2  ;;  %p1202_p9 = por %p1201_p12, %p1200_p1 }
  0x4e   : > { %p1198_p7 = pneg %p1197_p10 }
  0x50   : > { %p1203_p13 = pnand %p1202_p9, %p1198_p7 }
  0x52   : > { %1206 = shalt.err (!%p1203_p13)
}
  0x53   : > { %s1207_s29 = scalar_lea.vmem %s1490_s27, 256  ;;  %s1335_s10 = smov [#allocation2]  }
  0x54   : > { %p1208_p0 = scmp.ne.s32.totalorder %s1490_s27, %s1207_s29  ;;  %s1212_s14 = sshll.u32 %s1335_s10, 4  ;;  %s1213_s14 = int_to_ptr.vmem [resolvable:$false] %s1212_s14 }
  0x55   : > { %s1214_s30 = scalar_lea.vmem %s1213_s14, 512  ;;  %p1215_p6 = scmp.lt.s32.totalorder %s1490_s27, %s1213_s14 }
  0x56   : > { %p1210_p2 = pnand %p1208_p0, %p1196_p5  ;;  %p1216_p3 = scmp.lt.s32.totalorder %s1214_s30, %s1207_s29 }
  0x58   : > { %p1211_p10 = pneg %p1210_p2  ;;  %p1217_p4 = por %p1216_p3, %p1215_p6 }
  0x5a   : > { %p1218_p1 = pnand %p1217_p4, %p1211_p10 }
  0x5c   : > { %1221 = shalt.err (!%p1218_p1)
}
  0x5d   : > { %s1681_s2 = smov 4   ;;  %s1682_s3 = smov 64  }
  0x5e   : > { %1024 = dma.hbm_to_vmem [thread:$0]  (!%p1486_p11), %s1483_s17, 256, %s1490_s27, %s1497_s15, %s1682_s3, %s1682_s3, %s1681_s2  }
  0x5f   : > { %s248_s11 = scalar_lea.vmem [#allocation5], %s1478_s8  ;;  %s244_s16 = sand.u32 1, %s1326_s21  }
  0x60   : > { %s255_s7 = sshll.u32 %s248_s11, 4  ;;  %s245_s23 = scalar_lea.sflag [#allocation6], %s244_s16  ;;  %s1529_s7 = int_to_ptr.vmem [resolvable:$true] %s255_s7 }
  0x61   : > { %s1222_s29 = scalar_lea.hbm %s1495_s9, 256  ;;  %s1227_s30 = scalar_lea.hbm %s1655_s1, 512 }
  0x62   : > { %p1223_p4 = scmp.ne.s32.totalorder %s1495_s9, %s1222_s29  ;;  %p1228_p7 = scmp.lt.s32.totalorder %s1495_s9, %s1655_s1 }
  0x63   : > { %p1229_p12 = scmp.lt.s32.totalorder %s1227_s30, %s1222_s29 }
  0x64   : > { %p1225_p6 = pnand %p1223_p4, %p1196_p5 }
  0x65   : > { %p1230_p9 = por %p1229_p12, %p1228_p7 }
  0x66   : > { %p1226_p3 = pneg %p1225_p6 }
  0x68   : > { %p1231_p13 = pnand %p1230_p9, %p1226_p3 }
  0x6a   : > { %1234 = shalt.err (!%p1231_p13)
}
  0x6b   : > { %s1235_s8 = scalar_lea.vmem %s1529_s7, 256  ;;  %s1336_s17 = smov [#allocation5]  }
  0x6c   : > { %p1236_p0 = scmp.ne.s32.totalorder %s1529_s7, %s1235_s8  ;;  %s1240_s27 = sshll.u32 %s1336_s17, 4  ;;  %s1241_s27 = int_to_ptr.vmem [resolvable:$false] %s1240_s27 }
  0x6d   : > { %s1242_s15 = scalar_lea.vmem %s1241_s27, 512  ;;  %p1243_p1 = scmp.lt.s32.totalorder %s1529_s7, %s1241_s27 }
  0x6e   : > { %p1238_p2 = pnand %p1236_p0, %p1196_p5  ;;  %p1244_p4 = scmp.lt.s32.totalorder %s1242_s15, %s1235_s8 }
  0x70   : > { %p1239_p10 = pneg %p1238_p2  ;;  %p1245_p6 = por %p1244_p4, %p1243_p1 }
  0x72   : > { %p1246_p7 = pnand %p1245_p6, %p1239_p10 }
  0x74   : > { %1249 = shalt.err (!%p1246_p7)
}
  0x75   : > { %1027 = dma.hbm_to_vmem [thread:$0]  (!%p1486_p11), %s1495_s9, 256, %s1529_s7, %s245_s23, %s1682_s3, %s1682_s3, %s1681_s2  }
  0x76   : > { %267 = sbr.rel (%p1412_p8) target bundleno = 1034 (0x40a), region = 40  ;;  %s1559_s0 = sand.u32 (!%p1412_p8), 1, %s1318_s19  }
  0x77   : > { %s1562_s4 = sshll.u32 (!%p1412_p8), %s1559_s0, 4  ;;  %s270_s11 = scalar_lea.sflag (!%p1412_p8), [#allocation3], %s1559_s0 }
  0x78   : > { %s273_s28 = scalar_lea.vmem (!%p1412_p8), [#allocation2], %s1562_s4  ;;  %p1683_p5 = scmp.ne.s32.totalorder (!%p1412_p8), %s1671_s24, 0 }
  0x7b   : > { %1293 = dma.done.wait (%p1683_p5), %s270_s11, 256  }
  0x7c   : > { %1295 = vsyncadd (%p1683_p5), %s270_s11, 4294967040  ;;  %s278_s26 = sand.u32 1, %s1393_s22   ;;  %s282_s2 = scalar_lea.vmem [#allocation5], %s1562_s4 }
  0x7d   : > { %s279_s9 = scalar_lea.sflag [#allocation6], %s278_s26 }
  0x7e   : > { %1297 = dma.done.wait (%p1683_p5), %s279_s9, 256  }
  0x7f   : > { %1299 = vsyncadd (%p1683_p5), %s279_s9, 4294967040  ;;  %p1684_p8 = scmp.eq.s32.totalorder %s1393_s22, 0 }
  0x81   : > { %1301 = dma.done.wait (%p1684_p8), [#allocation6], 256   ;;  %p1685_p11 = pmov %p1684_p8 }
  0x82   : > { %p1686_p3 = pmov %p1684_p8 }
  0x83   : > { %1303 = vsyncadd (%p1685_p11), [#allocation6], 4294967040 }
  0x84   : > { %1305 = dma.done.wait (%p1686_p3), [#allocation9], 832   ;;  %p1687_p12 = pmov %p1686_p3 }
  0x85   : > { %vm454_vm0 = vcmask 1040384   ;;  %v1337_v0 = vmov 0   ;;  %v1083_v2 = vld [vmem:[#allocation8 + $0x10] ss:$0 sps:$4 sm:$0x11]   ;;  %v1084_v4 = vld [vmem:[#allocation8 + $0x8] sm:$0xff]  }
  0x86   : > { %1307 = vsyncadd (%p1687_p12), [#allocation9], 4294966464  ;;  %v456_v1 = vsel %vm454_vm0, 65535, %v1337_v0  ;;  %vm447_vm1 = vcmask 269312   ;;  %v1086_v5 = vld [vmem:[%s282_s2] sm:$0xff]   ;;  %v1087_v7 = vld [vmem:[%s282_s2 + $0x8] sm:$0xff]  }
  0x87   : > { %v458_v3 = vand.u32 %v1083_v2, %v456_v1  ;;  %v1085_v6 = vld [vmem:[#allocation8] sm:$0xff]   ;;  %973 = vmatprep.mubr.msk.bf16.mxu1 %vm447_vm1, %v1086_v5  ;;  %v1088_v8 = vld [vmem:[#allocation7 + $0x8] sm:$0xff]   ;;  %v1089_v9 = vld [vmem:[#allocation7] sm:$0xff]   ;;  %vm357_vm2 = vcmask 261120   ;;  %s1338_s24 = smov 96   ;;  %vm747_vm11 = vcmask 257024  }
  0x88   : > { %v1090_v10 = vld [vmem:[%s273_s28] sm:$0xff]   ;;  %959 = vmatprep.subr.bf16.mxu0 %v1088_v8  ;;  %v1091_v11 = vld [vmem:[%s273_s28 + $0x8] sm:$0xff]   ;;  %s325_s3 = scalar_lea.vmem [#allocation11], %s1562_s4  ;;  %s941_s16 = sshll.u32 %s1393_s22, 8 }
  0x89   : > { %967 = vmatprep.subr.bf16.mxu1 %v458_v3  ;;  %963 = vmatprep.mubr.msk.bf16.mxu0 %vm357_vm2, %v1090_v10  ;;  %v634_v63 = vld [vmem:[#allocation10 + $0x10] sm:$0xff]  ;;  %v635_v1 = vld [vmem:[#allocation10 + $0x18] sm:$0xff]  ;;  %v632_v2 = vld [vmem:[#allocation10] sm:$0xff]  ;;  %s766_s7 = sshll.u32 %s325_s3, 4  ;;  %s1610_s10 = scalar_lea.hbm %s1659_s5, %s941_s16  ;;  %s1603_s7 = int_to_ptr.vmem [resolvable:$true] %s766_s7 }
  0x8a   : > { %968 = vmatpush3.bf16.msra.mxu1 %v458_v3  ;;  %960 = vmatpush3.bf16.msra.mxu0 %v1088_v8  ;;  %s753_s14 = scalar_lea.sflag [#allocation4], %s1559_s0  ;;  %s1250_s22 = scalar_lea.vmem %s1603_s7, 256 }
  0x8b   : > { %969 = vmatprep.subr.bf16.mxu1 %v1084_v4  ;;  %961 = vmatprep.subr.bf16.mxu0 %v1089_v9  ;;  %p1251_p9 = scmp.ne.s32.totalorder %s1603_s7, %s1250_s22  ;;  %p1688_p13 = scmp.ne.s32.totalorder %s1678_s13, 0 }
  0x8c   : > { %s1339_s30 = smov [#allocation11]  }
  0x8d   : > { %p1252_p0 = pnand %p1251_p9, %p1688_p13  ;;  %s1254_s8 = sshll.u32 %s1339_s30, 4  ;;  %s1255_s8 = int_to_ptr.vmem [resolvable:$false] %s1254_s8 }
  0x8e   : > { %970 = vmatpush3.bf16.msra.mxu1 %v1084_v4  ;;  %962 = vmatpush3.bf16.msra.mxu0 %v1089_v9  ;;  %v633_v4 = vld [vmem:[#allocation10 + $0x8] sm:$0xff]  ;;  %s1256_s17 = scalar_lea.vmem %s1255_s8, 512  ;;  %p1257_p10 = scmp.lt.s32.totalorder %s1603_s7, %s1255_s8 }
  0x8f   : > { %971 = vmatprep.subr.bf16.mxu1 %v1085_v6  ;;  %p1253_p2 = pneg %p1252_p0  ;;  %p1258_p1 = scmp.lt.s32.totalorder %s1256_s17, %s1250_s22 }
  0x91   : > { %964 = vmatmul.mubr.msk.bf16.vlgmr.msra.gmra.mxu0 %vm357_vm2, %v1091_v11  ;;  %p1259_p4 = por %p1258_p1, %p1257_p10 }
  0x92   : > { %972 = vmatpush3.bf16.msra.mxu1 %v1085_v6 }
  0x93   : > { %p1260_p6 = pnand %p1259_p4, %p1253_p2 }
  0x95   : > { %974 = vmatmul.mubr.msk.bf16.vlgmr.msra.gmra.mxu1 %vm447_vm1, %v1087_v7 }
 0x151   : > { %v965_v36 = vpop.f32.mrf.mxu0 }
 0x152   : > { %v521_v37 = vmul.f32 1.442695, %v965_v36  ;;  %v515_v44 = vadd.f32 1.0, %v965_v36  ;;  %vm511_vm7 = vcmp.gt.f32.partialorder %v965_v36, 0.0 }
 0x153   : > { %v398_v38 = vpop.f32.mrf.mxu0 }
 0x154   : > { %v517_v39 = vmul.f32 1.442695, %v398_v38  ;;  %v513_v47 = vadd.f32 1.0, %v398_v38  ;;  %vm509_vm8 = vcmp.gt.f32.partialorder %v398_v38, 0.0 }
 0x155   : > { %v975_v12 = vpop.f32.mrf.mxu1  ;;  %v966_v40 = vpop.f32.mrf.mxu0 }
 0x156   : > { %v541_v19 = vmul.f32 1.442695, %v975_v12  ;;  %v535_v32 = vadd.f32 1.0, %v975_v12  ;;  %vm531_vm6 = vcmp.gt.f32.partialorder %v975_v12, 0.0  ;;  %v523_v41 = vmul.f32 1.442695, %v966_v40 }
 0x157   : > { %v494_v13 = vpop.f32.mrf.mxu1  ;;  %v401_v42 = vpop.f32.mrf.mxu0  ;;  %v516_v48 = vadd.f32 1.0, %v966_v40  ;;  %vm512_vm9 = vcmp.gt.f32.partialorder %v966_v40, 0.0 }
 0x158   : > { %v537_v14 = vmul.f32 1.442695, %v494_v13  ;;  %v533_v24 = vadd.f32 1.0, %v494_v13  ;;  %vm529_vm3 = vcmp.gt.f32.partialorder %v494_v13, 0.0  ;;  %v519_v43 = vmul.f32 1.442695, %v401_v42 }
 0x159   : > { %v976_v15 = vpop.f32.mrf.mxu1  ;;  %v514_v51 = vadd.f32 1.0, %v401_v42  ;;  %vm510_vm10 = vcmp.gt.f32.partialorder %v401_v42, 0.0 }
 0x15a   : > { %v543_v16 = vmul.f32 1.442695, %v976_v15  ;;  %v552_v17 = vpack.c.bf16 %v976_v15, %v975_v12  ;;  %1092 = vpow2.f32 %v537_v14  ;;  %v536_v27 = vadd.f32 1.0, %v976_v15 }
 0x15b   : > { %v497_v18 = vpop.f32.mrf.mxu1  ;;  %vm532_vm5 = vcmp.gt.f32.partialorder %v976_v15, 0.0 }
 0x15c   : > { %v539_v20 = vmul.f32 1.442695, %v497_v18  ;;  %573 = vrot.lane.b32.xlu0 %v552_v17, %s1338_s24  ;;  %1094 = vpow2.f32 %v543_v16  ;;  %v551_v21 = vpack.c.bf16 %v497_v18, %v494_v13  ;;  %v534_v25 = vadd.f32 1.0, %v497_v18 }
 0x15d   : > { %vm530_vm4 = vcmp.gt.f32.partialorder %v497_v18, 0.0 }
 0x15e   : > { %1096 = vpow2.f32 %v539_v20 }
 0x15f   : > { %1098 = vpow2.f32 %v541_v19 }
 0x160   : > { %571 = vrot.lane.b32.xlu0 %v551_v21, %s1338_s24  ;;  %1100 = vpow2.f32 %v521_v37 }
 0x161   : > { %1102 = vpow2.f32 %v517_v39 }
 0x162   : > { %1104 = vpow2.f32 %v523_v41 }
 0x163   : > { %1106 = vpow2.f32 %v519_v43 }
 0x167   : > { %v1093_v22 = vpop.eup %1092 }
 0x168   : > { %v545_v28 = vsel %vm529_vm3, %v533_v24, %v1093_v22 }
 0x169   : > { %v1095_v23 = vpop.eup %1094 }
 0x16a   : > { %v548_v33 = vsel %vm532_vm5, %v536_v27, %v1095_v23 }
 0x16b   : > { %v1097_v26 = vpop.eup %1096 }
 0x16c   : > { %v546_v29 = vsel %vm530_vm4, %v534_v25, %v1097_v26  ;;  %v1099_v30 = vpop.eup %1098 }
 0x16d   : > { %v549_v31 = vpack.c.bf16 %v546_v29, %v545_v28  ;;  %v547_v34 = vsel %vm531_vm6, %v535_v32, %v1099_v30  ;;  %v1101_v45 = vpop.eup %1100 }
 0x16e   : > { %v550_v35 = vpack.c.bf16 %v548_v33, %v547_v34  ;;  %v1103_v49 = vpop.eup %1102  ;;  %v527_v50 = vsel %vm511_vm7, %v515_v44, %v1101_v45 }
 0x16f   : > { %553 = vxpose.xlu1.c.b16.start [1/2] (short) (narrow) %v549_v31, 32  ;;  %v1105_v52 = vpop.eup %1104  ;;  %v525_v55 = vsel %vm509_vm8, %v513_v47, %v1103_v49 }
 0x170   : > { %v528_v56 = vsel %vm512_vm9, %v516_v48, %v1105_v52  ;;  %v1107_v57 = vpop.eup %1106 }
 0x171   : > { %v641_v58 = vpack.c.bf16 %v528_v56, %v527_v50  ;;  %v526_v59 = vsel %vm510_vm10, %v514_v51, %v1107_v57 }
 0x172   : > { %v640_v61 = vpack.c.bf16 %v526_v59, %v525_v55 }
 0x173   : > { %554 = vxpose.xlu1.c.b16.end [2/2] (short) (narrow) %v550_v35, 32 }
 0x174   : > { %989 = vmatprep.mubr.msk.bf16.mxu1 %vm357_vm2, %v640_v61 }
 0x1ce   : > { %v574_v46 = vpop.permute.xlu0 %573 }
 0x1cf   : > { %977 = vmatprep.subr.bf16.mxu0 %v574_v46 }
 0x1d0   : > { %978 = vmatpush3.bf16.msra.mxu0 %v574_v46 }
 0x1d1   : > { %v561_v53 = vpop.trf.xlu1 }
 0x1d2   : > { %v572_v54 = vpop.permute.xlu0 %571  ;;  %981 = vmatprep.mubr.msk.bf16.mxu0 %vm357_vm2, %v561_v53 }
 0x1d3   : > { %979 = vmatprep.subr.bf16.mxu0 %v572_v54 }
 0x1d4   : > { %980 = vmatpush3.bf16.msra.mxu0 %v572_v54 }
 0x1d5   : > { %v562_v60 = vpop.trf.xlu1 }
 0x1d7   : > { %982 = vmatmul.mubr.msk.bf16.vlgmr.msra.gmra.mxu0 %vm357_vm2, %v562_v60 }
 0x297   : > { %v983_v62 = vpop.f32.mrf.mxu0 }
 0x298   : > { %v638_v5 = vmul.f32 %v983_v62, %v634_v63 }
 0x299   : > { %v617_v0 = vpop.f32.mrf.mxu0 }
 0x29a   : > { %v636_v8 = vmul.f32 %v632_v2, %v617_v0 }
 0x29b   : > { %v984_v3 = vpop.f32.mrf.mxu0 }
 0x29c   : > { %v639_v6 = vmul.f32 %v984_v3, %v635_v1 }
 0x29d   : > { %v620_v7 = vpop.f32.mrf.mxu0 }
 0x29e   : > { %v643_v9 = vpack.c.bf16 %v639_v6, %v638_v5  ;;  %v637_v10 = vmul.f32 %v633_v4, %v620_v7 }
 0x2a0   : > { %v642_v11 = vpack.c.bf16 %v637_v10, %v636_v8  ;;  %985 = vmatprep.subr.bf16.mxu1 %v643_v9 }
 0x2a1   : > { %986 = vmatpush3.bf16.msra.mxu1 %v643_v9 }
 0x2a2   : > { %987 = vmatprep.subr.bf16.mxu1 %v642_v11 }
 0x2a5   : > { %988 = vmatpush3.bf16.msra.mxu1 %v642_v11 }
 0x2a8   : > { %990 = vmatmul.mubr.msk.bf16.vlgmr.msra.gmra.mxu1 %vm357_vm2, %v641_v58 }
 0x368   : > { %v991_v12 = vpop.f32.mrf.mxu1 }
 0x369   : > { %v701_v15 = vadd.f32 1e-06, %v991_v12 }
 0x36a   : > { %v684_v13 = vpop.f32.mrf.mxu1 }
 0x36b   : > { %v699_v14 = vadd.f32 1e-06, %v684_v13 }
 0x36c   : > { %v992_v16 = vpop.f32.mrf.mxu1 }
 0x36d   : > { %1108 = vrcp.f32 %v699_v14  ;;  %v702_v19 = vadd.f32 1e-06, %v992_v16 }
 0x36e   : > { %v687_v17 = vpop.f32.mrf.mxu1  ;;  %1110 = vrcp.f32 %v701_v15 }
 0x36f   : > { %v700_v18 = vadd.f32 1e-06, %v687_v17 }
 0x371   : > { %1112 = vrcp.f32 %v700_v18 }
 0x372   : > { %1114 = vrcp.f32 %v702_v19 }
 0x37a   : > { %v1109_v20 = vpop.eup %1108 }
 0x37b   : > { %711 = vrot.lane.b32.xlu0 %v1109_v20, %s1338_s24  ;;  %v1111_v21 = vpop.eup %1110 }
 0x37e   : > { %v1113_v22 = vpop.eup %1112 }
 0x37f   : > { %715 = vrot.lane.b32.xlu0 %v1111_v21, %s1338_s24  ;;  %713 = vrot.lane.b32.xlu1 %v1113_v22, %s1338_s24  ;;  %v1115_v23 = vpop.eup %1114 }
 0x383   : > { %717 = vrot.lane.b32.xlu1 %v1115_v23, %s1338_s24 }
 0x3ed   : > { %v712_v24 = vpop.permute.xlu0 %711 }
 0x3ee   : > { %v723_v25 = vmul.f32 %v712_v24, %v684_v13 }
 0x3f0   : > { %v727_v26 = vmul.f32 32.0, %v723_v25 }
 0x3f1   : > { %v716_v27 = vpop.permute.xlu0 %715  ;;  %v714_v28 = vpop.permute.xlu1 %713 }
 0x3f2   : > { %v937_v29 = vpack.c.bf16 %v727_v26, %v727_v26  ;;  %v725_v30 = vmul.f32 %v991_v12, %v716_v27  ;;  %v724_v31 = vmul.f32 %v714_v28, %v687_v17 }
 0x3f4   : > { %748 = vst.msk [vmem:[%s325_s3] sm:$0xf] %vm747_vm11, %v937_v29  ;;  %v729_v32 = vmul.f32 32.0, %v725_v30  ;;  %v728_v33 = vmul.f32 32.0, %v724_v31 }
 0x3f5   : > { %v718_v34 = vpop.permute.xlu1 %717 }
 0x3f6   : > { %v939_v35 = vpack.c.bf16 %v729_v32, %v729_v32  ;;  %v938_v36 = vpack.c.bf16 %v728_v33, %v728_v33  ;;  %v726_v37 = vmul.f32 %v992_v16, %v718_v34 }
 0x3f8   : > { %750 = vst.msk [vmem:[%s325_s3 + $0x8] sm:$0xf] %vm747_vm11, %v939_v35  ;;  %749 = vst.msk [vmem:[%s325_s3 + $0x4] sm:$0xf] %vm747_vm11, %v938_v36  ;;  %v730_v38 = vmul.f32 32.0, %v726_v37 }
 0x3fa   : > { %v940_v39 = vpack.c.bf16 %v730_v38, %v730_v38 }
 0x3fc   : > { %751 = vst.msk [vmem:[%s325_s3 + $0xc] sm:$0xf] %vm747_vm11, %v940_v39 }
 0x3fd   : > { %1263 = shalt.err (!%p1260_p6)
}
 0x3fe   : > { %s1264_s27 = scalar_lea.hbm %s1610_s10, 256  ;;  %s1268_s11 = scalar_lea.hbm %s1659_s5, 512 }
 0x3ff   : > { %p1265_p7 = scmp.ne.s32.totalorder %s1610_s10, %s1264_s27  ;;  %p1269_p11 = scmp.lt.s32.totalorder %s1610_s10, %s1659_s5 }
 0x400   : > { %p1270_p3 = scmp.lt.s32.totalorder %s1268_s11, %s1264_s27 }
 0x401   : > { %p1266_p5 = pnand %p1265_p7, %p1688_p13 }
 0x402   : > { %p1271_p12 = por %p1270_p3, %p1269_p11 }
 0x403   : > { %p1267_p8 = pneg %p1266_p5 }
 0x405   : > { %p1272_p9 = pnand %p1271_p12, %p1267_p8 }
 0x407   : > { %1275 = shalt.err (!%p1272_p9)
}
 0x408   : > { %s1340_s9 = smov 64   ;;  %s1341_s2 = smov 4  }
 0x409   : > { %1009 = dma.vmem_to_hbm [thread:$0]  (%p1688_p13), %s1603_s7, 256, %s1610_s10, %s753_s14, %s1340_s9, %s1340_s9, %s1341_s2  }
 0x40a PF: > { %s781_s24 = sand.u32 1, %s1314_s18   ;;  %p1689_p0 = scmp.ne.s32.totalorder %s1672_s25, 0 }
 0x40b   : > { %p1690_p2 = scmp.ge.s32.totalorder %s1326_s21, 2  ;;  %s782_s3 = scalar_lea.sflag [#allocation4], %s781_s24 }
 0x40d   : > { %p1029_p10 = pnand %p1690_p2, %p1689_p0 }
 0x40f   : > { %p1030_p1 = pneg %p1029_p10 }
 0x411   : > { %1309 = dma.done.wait (%p1030_p1), %s782_s3, 256  }
 0x412   : > { %1311 = vsyncadd (%p1030_p1), %s782_s3, 4294967040  ;;  %p22_p4 = scmp.ge.s32.totalorder %s1458_s6, 4   ;;  %s1691_s18 = smov %s1318_s19 }
 0x413   : > { %s1692_s19 = smov %s1322_s20  ;;  %s1693_s20 = smov %s1468_s12 }
 0x414   : > { %s1694_s21 = smov %s1458_s6  ;;  %24 = sbr.rel (!%p22_p4) target bundleno = 13 (0xd), region = 110 }
 0x419   :  { %787 = vsyncpa [#allocation3], 1 }
 0x41a   :  { %789 = vsyncpa [#allocation3 + $0x1], 1 }
 0x41b   :  { %790 = vsyncpa [#allocation6], 1 }
 0x41c   :  { %792 = vsyncpa [#allocation6 + $0x1], 1 }
 0x41d   :  { %793 = vsyncpa [#allocation9], 1 }
 0x41e   :  { %794 = vsyncpa [#allocation4], 1 }
 0x41f   :  { %796 = vsyncpa [#allocation4 + $0x1], 1 }

</bundles_post_ra>
